<compile_context>
chip_gen: v6e
topology: v6e:2x2x1
jax: 0.10.0
libtpu: 0.0.40
codegen_flags: <defaults>
</compile_context>

<pallas_src>
import functools

import jax
import jax.numpy as jnp
import numpy as np
from jax import lax
from jax.experimental import pallas as pl
from jax.experimental.pallas import tpu as pltpu

BN_EPS = 1e-5


def _vmem_limit_bytes(default_cap=64 * 1024 * 1024):
    """Generation-aware VMEM budget: ~75% of physical VMEM (48 MiB v7x, 96 MiB v5e/v6e)."""
    cap = None
    try:
        info = pltpu.get_tpu_info()
        for name in ("vmem_capacity_bytes", "vmem_size_bytes", "vmem_bytes"):
            cap = getattr(info, name, None)
            if cap:
                break
    except Exception:
        cap = None
    if not cap:
        cap = default_cap
    return int(cap) * 3 // 4


def _pick_row_chunk(h2, w2p, max_lanes=4096):
    """Rows-per-chunk RB: a divisor of H2 with RB*W2p <= max_lanes, preferring >=2 chunks."""
    divs = [d for d in range(1, h2 + 1) if h2 % d == 0]
    cands = [d for d in divs if d * w2p <= max_lanes and h2 // d >= 2]
    if not cands:
        cands = [d for d in divs if d * w2p <= max_lanes]
    if not cands:
        return 1
    return max(cands)


def _conv_stats_kernel(x_ref, w_ref, m_ref, y_ref, s_ref, *, w2p):
    """Pass 1: 3x3 conv over one row-chunk + per-chunk BN partial sums.

    x_ref: (Cin, (RB+2)*W2p + 2) bf16  flattened halo'd chunk of upsampled, zero-padded image
    w_ref: (9, Cout, Cin)        bf16  conv weight, one (Cout, Cin) slab per tap (ky, kx)
    m_ref: (1, RB*W2p)           f32   1.0 on valid columns (col < W2), 0.0 on 2 pad cols
    y_ref: (Cout, RB*W2p)        bf16  conv output (padded-width flat layout, no bias)
    s_ref: (Cout, 2)             f32   per-chunk [sum, sum_of_squares] over valid positions
    """
    lc = y_ref.shape[-1]

    # 9 accumulating MXU matmuls (K = Cin), each against a static lane-shifted bf16
    # slice of the flattened chunk. No patch materialization, no f32 round-trip.
    conv = None
    for ky in range(3):
        for kx in range(3):
            off = ky * w2p + kx
            part = jnp.dot(w_ref[ky * 3 + kx], x_ref[:, off:off + lc],
                           preferred_element_type=jnp.float32)
            conv = part if conv is None else conv + part

    # BatchNorm partial stats in f32, masking the 2 junk columns per row.
    mask = m_ref[...]                                     # (1, Lc)
    cm = conv * mask
    s_ref[...] = jnp.concatenate(                         # single store
        [jnp.sum(cm, axis=1, keepdims=True),
         jnp.sum(cm * conv, axis=1, keepdims=True)], axis=1)

    y_ref[...] = conv.astype(y_ref.dtype)                 # lane-dense bf16 store


def _bn_relu_kernel(y_ref, sc_ref, sh_ref, o_ref):
    """Pass 2: y*scale + shift, ReLU. Fully lane-dense on the padded flat chunk.

    y_ref: (Cout, RB*W2p) bf16 ; sc_ref/sh_ref: (Cout, 1) f32 ; o_ref: (Cout, RB*W2p) f32
    """
    y = y_ref[...].astype(jnp.float32)
    o_ref[...] = jnp.maximum(y * sc_ref[...] + sh_ref[...], 0.0)


@functools.partial(jax.jit, static_argnames=("scale_factor",))
def up_conv_forward(x, weight, conv_bias, gamma, beta, scale_factor=2):
    """x: (N, Cin, H, W) f32; weight: (Cout, Cin, 3, 3) PyTorch OIHW.

    Returns (N, Cout, H*s, W*s) f32, matching the PyTorch module's forward.
    NOTE: conv_bias is intentionally unused in the fused path — a per-channel
    constant shift cancels exactly under training-mode BatchNorm.
    """
    del conv_bias  # cancels under BatchNorm (shift invariance); kept for API parity.
    N, Cin, H, W = x.shape
    Cout = weight.shape[0]
    s = scale_factor
    H2, W2 = H * s, W * s
    W2p = W2 + 2                            # padded row width kept through the pipeline
    RB = _pick_row_chunk(H2, W2p)           # output rows per chunk (divides H2)
    NC = H2 // RB                           # number of row chunks
    Lc = RB * W2p                           # flat conv-output length per chunk
    Lc_in = (RB + 2) * W2p + 2              # flat halo'd chunk input length (+2 tail)

    # ---- XLA-side layout prep (bf16): nearest 2x upsample, zero pad, halo'd chunks ----
    # TODO(synk): fold the nearest upsample into the kernel via the 2x2 sub-filter
    # (pixel-shuffle) weight transform to remove this 4x-inflated producer pass.
    xu = jnp.repeat(jnp.repeat(x, s, axis=2), s, axis=3)                  # (N,Cin,H2,W2)
    xp = jnp.pad(xu, ((0, 0), (0, 0), (1, 1), (1, 1))).astype(jnp.bfloat16)  # (N,Cin,H2+2,W2p)
    row_idx = jnp.arange(NC)[:, None] * RB + jnp.arange(RB + 2)[None, :]  # (NC, RB+2)
    xc = xp[:, :, row_idx, :]                                             # (N,Cin,NC,RB+2,W2p)
    xc = jnp.transpose(xc, (0, 2, 1, 3, 4)).reshape(N, NC, Cin, (RB + 2) * W2p)
    xc = jnp.pad(xc, ((0, 0), (0, 0), (0, 0), (0, 2)))                    # (N,NC,Cin,Lc_in)

    # weight (Cout, Cin, 3, 3) -> (9, Cout, Cin): one (Cout, Cin) slab per tap.
    wmat = jnp.transpose(weight, (2, 3, 0, 1)).reshape(9, Cout, Cin).astype(jnp.bfloat16)

    # valid-column mask for the padded-width flat layout.
    col = jnp.arange(Lc, dtype=jnp.int32) % W2p
    mask = (col < W2).astype(jnp.float32).reshape(1, Lc)

    kernel1 = functools.partial(_conv_stats_kernel, w2p=W2p)
    cparams = pltpu.CompilerParams(
        dimension_semantics=("parallel", "parallel"),   # batch x row-chunk, megacore-friendly
        vmem_limit_bytes=_vmem_limit_bytes(),
    )

    # ---- pass 1: conv + per-chunk BN partial sums ----
    y_c, stats = pl.pallas_call(
        kernel1,
        grid=(N, NC),
        in_specs=[
            pl.BlockSpec((None, None, Cin, Lc_in), lambda n, c: (n, c, 0, 0)),
            pl.BlockSpec((9, Cout, Cin), lambda n, c: (0, 0, 0)),
            pl.BlockSpec((1, Lc), lambda n, c: (0, 0)),
        ],
        out_specs=(
            pl.BlockSpec((None, None, Cout, Lc), lambda n, c: (n, c, 0, 0)),
            pl.BlockSpec((None, None, Cout, 2), lambda n, c: (n, c, 0, 0)),
        ),
        out_shape=(
            jax.ShapeDtypeStruct((N, NC, Cout, Lc), jnp.bfloat16),
            jax.ShapeDtypeStruct((N, NC, Cout, 2), jnp.float32),
        ),
        compiler_params=cparams,
    )(xc, wmat, mask)

    # ---- tiny cross-chunk / cross-image stats combine (f32, in XLA) ----
    cnt = jnp.float32(N * H2 * W2)
    s_sum = jnp.sum(stats, axis=(0, 1))                      # (Cout, 2)
    m0 = s_sum[:, 0] / cnt                                   # mean of (bias-free) conv
    var = jnp.maximum(s_sum[:, 1] / cnt - m0 * m0, 0.0)
    scale = gamma.astype(jnp.float32) * lax.rsqrt(var + BN_EPS)
    shift = beta.astype(jnp.float32) - m0 * scale

    # ---- pass 2: BN affine + ReLU, lane-dense on the padded flat chunks ----
    out_c = pl.pallas_call(
        _bn_relu_kernel,
        grid=(N, NC),
        in_specs=[
            pl.BlockSpec((None, None, Cout, Lc), lambda n, c: (n, c, 0, 0)),
            pl.BlockSpec((Cout, 1), lambda n, c: (0, 0)),
            pl.BlockSpec((Cout, 1), lambda n, c: (0, 0)),
        ],
        out_specs=pl.BlockSpec((None, None, Cout, Lc), lambda n, c: (n, c, 0, 0)),
        out_shape=jax.ShapeDtypeStruct((N, NC, Cout, Lc), jnp.float32),
        compiler_params=cparams,
    )(y_c, scale.reshape(Cout, 1), shift.reshape(Cout, 1))

    # ---- final assembly: reorder chunks and strip the 2 pad columns (one XLA pass) ----
    out = out_c.reshape(N, NC, Cout, RB, W2p)
    out = jnp.transpose(out, (0, 2, 1, 3, 4)).reshape(N, Cout, H2, W2p)
    return out[..., :W2]


def up_conv_reference(x, weight, conv_bias, gamma, beta, scale_factor=2):
    """Pure-JAX reference mirroring the PyTorch module (training-mode BN)."""
    s = scale_factor
    xu = jnp.repeat(jnp.repeat(x, s, axis=2), s, axis=3)
    y = lax.conv_general_dilated(
        xu, weight, window_strides=(1, 1), padding=((1, 1), (1, 1)),
        dimension_numbers=("NCHW", "OIHW", "NCHW"))
    y = y + conv_bias[None, :, None, None]
    mean = jnp.mean(y, axis=(0, 2, 3), keepdims=True)
    var = jnp.mean((y - mean) ** 2, axis=(0, 2, 3), keepdims=True)
    y = (y - mean) * lax.rsqrt(var + BN_EPS)
    y = y * gamma[None, :, None, None] + beta[None, :, None, None]
    return jnp.maximum(y, 0.0)


if __name__ == "__main__":
    # Small shapes consistent with the module: batch=2, in_ch=4, out_ch=8, 16x16.
    N, in_ch, out_ch, H, W = 2, 4, 8, 16, 16

    key = jax.random.PRNGKey(0)
    kx, kw, kb, kg, kbt = jax.random.split(key, 5)

    x = jax.random.normal(kx, (N, in_ch, H, W), jnp.float32)
    # Conv2d(in_ch, out_ch, 3, padding=1, bias=True): PyTorch OIHW weight layout.
    weight = jax.random.normal(kw, (out_ch, in_ch, 3, 3), jnp.float32) * 0.1
    conv_bias = jax.random.normal(kb, (out_ch,), jnp.float32) * 0.1
    # BatchNorm2d(out_ch) affine params.
    gamma = 1.0 + 0.1 * jax.random.normal(kg, (out_ch,), jnp.float32)
    beta = 0.1 * jax.random.normal(kbt, (out_ch,), jnp.float32)

    out = up_conv_forward(x, weight, conv_bias, gamma, beta)
    out = jax.block_until_ready(out)
    assert out.shape == (N, out_ch, 2 * H, 2 * W)

    ref = up_conv_reference(x, weight, conv_bias, gamma, beta)
    # bf16 MXU operands with f32 accumulation -> slightly looser tolerance than f32.
    np.testing.assert_allclose(np.asarray(out), np.asarray(ref), rtol=2e-2, atol=2e-2)

    print("KERNEL_OK")
</pallas_src>

<mosaic_0001>
module attributes {stable_mosaic.version = 11 : i64} {
  func.func @_conv_stats_kernel(%arg0: i32, %arg1: i32, %arg2: memref<1x1x4x614xbf16, #tpu.memory_space<vmem>>, %arg3: memref<9x8x4xbf16, #tpu.memory_space<vmem>>, %arg4: memref<1x544xf32, #tpu.memory_space<vmem>>, %arg5: memref<1x1x8x544xbf16, #tpu.memory_space<vmem>>, %arg6: memref<1x1x8x2xf32, #tpu.memory_space<vmem>>) attributes {dimension_semantics = [#tpu.dimension_semantics<parallel>, #tpu.dimension_semantics<parallel>], iteration_bounds = array<i64: 2, 2>, scalar_prefetch = 0 : i64, scratch_operands = 0 : i64, tpu.core_type = #tpu.core_type<tc>, window_params = [{transform_indices = @transform_0, window_bounds = array<i64: 1, 1, 4, 614>}, {pipeline_mode = #tpu.pipeline_mode<synchronous>, transform_indices = @transform_1, window_bounds = array<i64: 9, 8, 4>}, {pipeline_mode = #tpu.pipeline_mode<synchronous>, transform_indices = @transform_2, window_bounds = array<i64: 1, 544>}, {transform_indices = @transform_3, window_bounds = array<i64: 1, 1, 8, 544>}, {transform_indices = @transform_4, window_bounds = array<i64: 1, 1, 8, 2>}]} {
    %c0 = arith.constant 0 : index
    %c0_0 = arith.constant 0 : index
    %c0_1 = arith.constant 0 : index
    %0 = vector.load %arg3[%c0, %c0_0, %c0_1] : memref<9x8x4xbf16, #tpu.memory_space<vmem>>, vector<1x8x4xbf16>
    %1 = vector.shape_cast %0 : vector<1x8x4xbf16> to vector<8x4xbf16>
    %c0_2 = arith.constant 0 : index
    %c0_3 = arith.constant 0 : index
    %c0_4 = arith.constant 0 : index
    %c0_5 = arith.constant 0 : index
    %2 = vector.load %arg2[%c0_2, %c0_3, %c0_4, %c0_5] : memref<1x1x4x614xbf16, #tpu.memory_space<vmem>>, vector<1x1x4x544xbf16>
    %3 = vector.shape_cast %2 : vector<1x1x4x544xbf16> to vector<4x544xbf16>
    %cst = arith.constant dense<0.000000e+00> : vector<8x544xf32>
    %4 = tpu.matmul %1, %3, %cst {dimension_numbers = #tpu.dot_dimension_numbers<[1], [0], [0], [1], [0, 0, 1, 1], [], []>} : vector<8x4xbf16>, vector<4x544xbf16>, vector<8x544xf32> -> vector<8x544xf32>
    %c1 = arith.constant 1 : index
    %c0_6 = arith.constant 0 : index
    %c0_7 = arith.constant 0 : index
    %5 = vector.load %arg3[%c1, %c0_6, %c0_7] : memref<9x8x4xbf16, #tpu.memory_space<vmem>>, vector<1x8x4xbf16>
    %6 = vector.shape_cast %5 : vector<1x8x4xbf16> to vector<8x4xbf16>
    %c0_8 = arith.constant 0 : index
    %c0_9 = arith.constant 0 : index
    %c0_10 = arith.constant 0 : index
    %c1_11 = arith.constant 1 : index
    %7 = vector.load %arg2[%c0_8, %c0_9, %c0_10, %c1_11] : memref<1x1x4x614xbf16, #tpu.memory_space<vmem>>, vector<1x1x4x544xbf16>
    %8 = vector.shape_cast %7 : vector<1x1x4x544xbf16> to vector<4x544xbf16>
    %cst_12 = arith.constant dense<0.000000e+00> : vector<8x544xf32>
    %9 = tpu.matmul %6, %8, %cst_12 {dimension_numbers = #tpu.dot_dimension_numbers<[1], [0], [0], [1], [0, 0, 1, 1], [], []>} : vector<8x4xbf16>, vector<4x544xbf16>, vector<8x544xf32> -> vector<8x544xf32>
    %10 = arith.addf %4, %9 : vector<8x544xf32>
    %c2 = arith.constant 2 : index
    %c0_13 = arith.constant 0 : index
    %c0_14 = arith.constant 0 : index
    %11 = vector.load %arg3[%c2, %c0_13, %c0_14] : memref<9x8x4xbf16, #tpu.memory_space<vmem>>, vector<1x8x4xbf16>
    %12 = vector.shape_cast %11 : vector<1x8x4xbf16> to vector<8x4xbf16>
    %c0_15 = arith.constant 0 : index
    %c0_16 = arith.constant 0 : index
    %c0_17 = arith.constant 0 : index
    %c2_18 = arith.constant 2 : index
    %13 = vector.load %arg2[%c0_15, %c0_16, %c0_17, %c2_18] : memref<1x1x4x614xbf16, #tpu.memory_space<vmem>>, vector<1x1x4x544xbf16>
    %14 = vector.shape_cast %13 : vector<1x1x4x544xbf16> to vector<4x544xbf16>
    %cst_19 = arith.constant dense<0.000000e+00> : vector<8x544xf32>
    %15 = tpu.matmul %12, %14, %cst_19 {dimension_numbers = #tpu.dot_dimension_numbers<[1], [0], [0], [1], [0, 0, 1, 1], [], []>} : vector<8x4xbf16>, vector<4x544xbf16>, vector<8x544xf32> -> vector<8x544xf32>
    %16 = arith.addf %10, %15 : vector<8x544xf32>
    %c3 = arith.constant 3 : index
    %c0_20 = arith.constant 0 : index
    %c0_21 = arith.constant 0 : index
    %17 = vector.load %arg3[%c3, %c0_20, %c0_21] : memref<9x8x4xbf16, #tpu.memory_space<vmem>>, vector<1x8x4xbf16>
    %18 = vector.shape_cast %17 : vector<1x8x4xbf16> to vector<8x4xbf16>
    %c0_22 = arith.constant 0 : index
    %c0_23 = arith.constant 0 : index
    %c0_24 = arith.constant 0 : index
    %c34 = arith.constant 34 : index
    %19 = vector.load %arg2[%c0_22, %c0_23, %c0_24, %c34] : memref<1x1x4x614xbf16, #tpu.memory_space<vmem>>, vector<1x1x4x544xbf16>
    %20 = vector.shape_cast %19 : vector<1x1x4x544xbf16> to vector<4x544xbf16>
    %cst_25 = arith.constant dense<0.000000e+00> : vector<8x544xf32>
    %21 = tpu.matmul %18, %20, %cst_25 {dimension_numbers = #tpu.dot_dimension_numbers<[1], [0], [0], [1], [0, 0, 1, 1], [], []>} : vector<8x4xbf16>, vector<4x544xbf16>, vector<8x544xf32> -> vector<8x544xf32>
    %22 = arith.addf %16, %21 : vector<8x544xf32>
    %c4 = arith.constant 4 : index
    %c0_26 = arith.constant 0 : index
    %c0_27 = arith.constant 0 : index
    %23 = vector.load %arg3[%c4, %c0_26, %c0_27] : memref<9x8x4xbf16, #tpu.memory_space<vmem>>, vector<1x8x4xbf16>
    %24 = vector.shape_cast %23 : vector<1x8x4xbf16> to vector<8x4xbf16>
    %c0_28 = arith.constant 0 : index
    %c0_29 = arith.constant 0 : index
    %c0_30 = arith.constant 0 : index
    %c35 = arith.constant 35 : index
    %25 = vector.load %arg2[%c0_28, %c0_29, %c0_30, %c35] : memref<1x1x4x614xbf16, #tpu.memory_space<vmem>>, vector<1x1x4x544xbf16>
    %26 = vector.shape_cast %25 : vector<1x1x4x544xbf16> to vector<4x544xbf16>
    %cst_31 = arith.constant dense<0.000000e+00> : vector<8x544xf32>
    %27 = tpu.matmul %24, %26, %cst_31 {dimension_numbers = #tpu.dot_dimension_numbers<[1], [0], [0], [1], [0, 0, 1, 1], [], []>} : vector<8x4xbf16>, vector<4x544xbf16>, vector<8x544xf32> -> vector<8x544xf32>
    %28 = arith.addf %22, %27 : vector<8x544xf32>
    %c5 = arith.constant 5 : index
    %c0_32 = arith.constant 0 : index
    %c0_33 = arith.constant 0 : index
    %29 = vector.load %arg3[%c5, %c0_32, %c0_33] : memref<9x8x4xbf16, #tpu.memory_space<vmem>>, vector<1x8x4xbf16>
    %30 = vector.shape_cast %29 : vector<1x8x4xbf16> to vector<8x4xbf16>
    %c0_34 = arith.constant 0 : index
    %c0_35 = arith.constant 0 : index
    %c0_36 = arith.constant 0 : index
    %c36 = arith.constant 36 : index
    %31 = vector.load %arg2[%c0_34, %c0_35, %c0_36, %c36] : memref<1x1x4x614xbf16, #tpu.memory_space<vmem>>, vector<1x1x4x544xbf16>
    %32 = vector.shape_cast %31 : vector<1x1x4x544xbf16> to vector<4x544xbf16>
    %cst_37 = arith.constant dense<0.000000e+00> : vector<8x544xf32>
    %33 = tpu.matmul %30, %32, %cst_37 {dimension_numbers = #tpu.dot_dimension_numbers<[1], [0], [0], [1], [0, 0, 1, 1], [], []>} : vector<8x4xbf16>, vector<4x544xbf16>, vector<8x544xf32> -> vector<8x544xf32>
    %34 = arith.addf %28, %33 : vector<8x544xf32>
    %c6 = arith.constant 6 : index
    %c0_38 = arith.constant 0 : index
    %c0_39 = arith.constant 0 : index
    %35 = vector.load %arg3[%c6, %c0_38, %c0_39] : memref<9x8x4xbf16, #tpu.memory_space<vmem>>, vector<1x8x4xbf16>
    %36 = vector.shape_cast %35 : vector<1x8x4xbf16> to vector<8x4xbf16>
    %c0_40 = arith.constant 0 : index
    %c0_41 = arith.constant 0 : index
    %c0_42 = arith.constant 0 : index
    %c68 = arith.constant 68 : index
    %37 = vector.load %arg2[%c0_40, %c0_41, %c0_42, %c68] : memref<1x1x4x614xbf16, #tpu.memory_space<vmem>>, vector<1x1x4x544xbf16>
    %38 = vector.shape_cast %37 : vector<1x1x4x544xbf16> to vector<4x544xbf16>
    %cst_43 = arith.constant dense<0.000000e+00> : vector<8x544xf32>
    %39 = tpu.matmul %36, %38, %cst_43 {dimension_numbers = #tpu.dot_dimension_numbers<[1], [0], [0], [1], [0, 0, 1, 1], [], []>} : vector<8x4xbf16>, vector<4x544xbf16>, vector<8x544xf32> -> vector<8x544xf32>
    %40 = arith.addf %34, %39 : vector<8x544xf32>
    %c7 = arith.constant 7 : index
    %c0_44 = arith.constant 0 : index
    %c0_45 = arith.constant 0 : index
    %41 = vector.load %arg3[%c7, %c0_44, %c0_45] : memref<9x8x4xbf16, #tpu.memory_space<vmem>>, vector<1x8x4xbf16>
    %42 = vector.shape_cast %41 : vector<1x8x4xbf16> to vector<8x4xbf16>
    %c0_46 = arith.constant 0 : index
    %c0_47 = arith.constant 0 : index
    %c0_48 = arith.constant 0 : index
    %c69 = arith.constant 69 : index
    %43 = vector.load %arg2[%c0_46, %c0_47, %c0_48, %c69] : memref<1x1x4x614xbf16, #tpu.memory_space<vmem>>, vector<1x1x4x544xbf16>
    %44 = vector.shape_cast %43 : vector<1x1x4x544xbf16> to vector<4x544xbf16>
    %cst_49 = arith.constant dense<0.000000e+00> : vector<8x544xf32>
    %45 = tpu.matmul %42, %44, %cst_49 {dimension_numbers = #tpu.dot_dimension_numbers<[1], [0], [0], [1], [0, 0, 1, 1], [], []>} : vector<8x4xbf16>, vector<4x544xbf16>, vector<8x544xf32> -> vector<8x544xf32>
    %46 = arith.addf %40, %45 : vector<8x544xf32>
    %c8 = arith.constant 8 : index
    %c0_50 = arith.constant 0 : index
    %c0_51 = arith.constant 0 : index
    %47 = vector.load %arg3[%c8, %c0_50, %c0_51] : memref<9x8x4xbf16, #tpu.memory_space<vmem>>, vector<1x8x4xbf16>
    %48 = vector.shape_cast %47 : vector<1x8x4xbf16> to vector<8x4xbf16>
    %c0_52 = arith.constant 0 : index
    %c0_53 = arith.constant 0 : index
    %c0_54 = arith.constant 0 : index
    %c70 = arith.constant 70 : index
    %49 = vector.load %arg2[%c0_52, %c0_53, %c0_54, %c70] : memref<1x1x4x614xbf16, #tpu.memory_space<vmem>>, vector<1x1x4x544xbf16>
    %50 = vector.shape_cast %49 : vector<1x1x4x544xbf16> to vector<4x544xbf16>
    %cst_55 = arith.constant dense<0.000000e+00> : vector<8x544xf32>
    %51 = tpu.matmul %48, %50, %cst_55 {dimension_numbers = #tpu.dot_dimension_numbers<[1], [0], [0], [1], [0, 0, 1, 1], [], []>} : vector<8x4xbf16>, vector<4x544xbf16>, vector<8x544xf32> -> vector<8x544xf32>
    %52 = arith.addf %46, %51 : vector<8x544xf32>
    %c0_56 = arith.constant 0 : index
    %c0_57 = arith.constant 0 : index
    %53 = vector.load %arg4[%c0_56, %c0_57] : memref<1x544xf32, #tpu.memory_space<vmem>>, vector<1x544xf32>
    %54 = vector.broadcast %53 : vector<1x544xf32> to vector<8x544xf32>
    %55 = arith.mulf %52, %54 : vector<8x544xf32>
    %cst_58 = arith.constant dense<0.000000e+00> : vector<8xf32>
    %56 = vector.multi_reduction <add>, %55, %cst_58 [1] : vector<8x544xf32> to vector<8xf32>
    %57 = vector.shape_cast %56 : vector<8xf32> to vector<8x1xf32>
    %58 = arith.mulf %55, %52 : vector<8x544xf32>
    %cst_59 = arith.constant dense<0.000000e+00> : vector<8xf32>
    %59 = vector.multi_reduction <add>, %58, %cst_59 [1] : vector<8x544xf32> to vector<8xf32>
    %60 = vector.shape_cast %59 : vector<8xf32> to vector<8x1xf32>
    %61 = tpu.concatenate %57, %60 in 1 : vector<8x1xf32>, vector<8x1xf32> -> vector<8x2xf32>
    %c0_60 = arith.constant 0 : index
    %c0_61 = arith.constant 0 : index
    %c0_62 = arith.constant 0 : index
    %c0_63 = arith.constant 0 : index
    %62 = vector.load %arg6[%c0_60, %c0_61, %c0_62, %c0_63] : memref<1x1x8x2xf32, #tpu.memory_space<vmem>>, vector<1x1x8x2xf32>
    %63 = vector.shape_cast %62 : vector<1x1x8x2xf32> to vector<8x2xf32>
    %64 = vector.shape_cast %61 : vector<8x2xf32> to vector<1x1x8x2xf32>
    tpu.vector_store %arg6[%c0_60, %c0_61, %c0_62, %c0_63], %64 {strides = array<i32>} : memref<1x1x8x2xf32, #tpu.memory_space<vmem>>, vector<1x1x8x2xf32>,
    %65 = arith.truncf %52 : vector<8x544xf32> to vector<8x544xbf16>
    %c0_64 = arith.constant 0 : index
    %c0_65 = arith.constant 0 : index
    %c0_66 = arith.constant 0 : index
    %c0_67 = arith.constant 0 : index
    %66 = vector.load %arg5[%c0_64, %c0_65, %c0_66, %c0_67] : memref<1x1x8x544xbf16, #tpu.memory_space<vmem>>, vector<1x1x8x544xbf16>
    %67 = vector.shape_cast %66 : vector<1x1x8x544xbf16> to vector<8x544xbf16>
    %68 = vector.shape_cast %65 : vector<8x544xbf16> to vector<1x1x8x544xbf16>
    tpu.vector_store %arg5[%c0_64, %c0_65, %c0_66, %c0_67], %68 {strides = array<i32>} : memref<1x1x8x544xbf16, #tpu.memory_space<vmem>>, vector<1x1x8x544xbf16>,
    return
  }
  func.func @transform_0(%arg0: i32, %arg1: i32) -> (i32, i32, i32, i32) {
    %c0_i32 = arith.constant 0 : i32
    %c0_i32_0 = arith.constant 0 : i32
    %c0_i32_1 = arith.constant 0 : i32
    return %arg0, %arg1, %c0_i32, %c0_i32_0 : i32, i32, i32, i32
  }
  func.func @transform_1(%arg0: i32, %arg1: i32) -> (i32, i32, i32) {
    %c0_i32 = arith.constant 0 : i32
    %c0_i32_0 = arith.constant 0 : i32
    %c0_i32_1 = arith.constant 0 : i32
    %c0_i32_2 = arith.constant 0 : i32
    return %c0_i32, %c0_i32_0, %c0_i32_1 : i32, i32, i32
  }
  func.func @transform_2(%arg0: i32, %arg1: i32) -> (i32, i32) {
    %c0_i32 = arith.constant 0 : i32
    %c0_i32_0 = arith.constant 0 : i32
    %c0_i32_1 = arith.constant 0 : i32
    return %c0_i32, %c0_i32_0 : i32, i32
  }
  func.func @transform_3(%arg0: i32, %arg1: i32) -> (i32, i32, i32, i32) {
    %c0_i32 = arith.constant 0 : i32
    %c0_i32_0 = arith.constant 0 : i32
    %c0_i32_1 = arith.constant 0 : i32
    return %arg0, %arg1, %c0_i32, %c0_i32_0 : i32, i32, i32, i32
  }
  func.func @transform_4(%arg0: i32, %arg1: i32) -> (i32, i32, i32, i32) {
    %c0_i32 = arith.constant 0 : i32
    %c0_i32_0 = arith.constant 0 : i32
    %c0_i32_1 = arith.constant 0 : i32
    return %arg0, %arg1, %c0_i32, %c0_i32_0 : i32, i32, i32, i32
  }
}

module attributes {stable_mosaic.version = 11 : i64} {
  func.func @_bn_relu_kernel(%arg0: i32, %arg1: i32, %arg2: memref<1x1x8x544xbf16, #tpu.memory_space<vmem>>, %arg3: memref<8x1xf32, #tpu.memory_space<vmem>>, %arg4: memref<8x1xf32, #tpu.memory_space<vmem>>, %arg5: memref<1x1x8x544xf32, #tpu.memory_space<vmem>>) attributes {dimension_semantics = [#tpu.dimension_semantics<parallel>, #tpu.dimension_semantics<parallel>], iteration_bounds = array<i64: 2, 2>, scalar_prefetch = 0 : i64, scratch_operands = 0 : i64, tpu.core_type = #tpu.core_type<tc>, window_params = [{transform_indices = @transform_0, window_bounds = array<i64: 1, 1, 8, 544>}, {pipeline_mode = #tpu.pipeline_mode<synchronous>, transform_indices = @transform_1, window_bounds = array<i64: 8, 1>}, {pipeline_mode = #tpu.pipeline_mode<synchronous>, transform_indices = @transform_2, window_bounds = array<i64: 8, 1>}, {transform_indices = @transform_3, window_bounds = array<i64: 1, 1, 8, 544>}]} {
    %c0 = arith.constant 0 : index
    %c0_0 = arith.constant 0 : index
    %c0_1 = arith.constant 0 : index
    %c0_2 = arith.constant 0 : index
    %0 = vector.load %arg2[%c0, %c0_0, %c0_1, %c0_2] : memref<1x1x8x544xbf16, #tpu.memory_space<vmem>>, vector<1x1x8x544xbf16>
    %1 = vector.shape_cast %0 : vector<1x1x8x544xbf16> to vector<8x544xbf16>
    %2 = arith.extf %1 : vector<8x544xbf16> to vector<8x544xf32>
    %c0_3 = arith.constant 0 : index
    %c0_4 = arith.constant 0 : index
    %3 = vector.load %arg3[%c0_3, %c0_4] : memref<8x1xf32, #tpu.memory_space<vmem>>, vector<8x1xf32>
    %4 = vector.broadcast %3 : vector<8x1xf32> to vector<8x544xf32>
    %5 = arith.mulf %2, %4 : vector<8x544xf32>
    %c0_5 = arith.constant 0 : index
    %c0_6 = arith.constant 0 : index
    %6 = vector.load %arg4[%c0_5, %c0_6] : memref<8x1xf32, #tpu.memory_space<vmem>>, vector<8x1xf32>
    %7 = vector.broadcast %6 : vector<8x1xf32> to vector<8x544xf32>
    %8 = arith.addf %5, %7 : vector<8x544xf32>
    %cst = arith.constant 0.000000e+00 : f32
    %9 = vector.broadcast %cst : f32 to vector<8x544xf32>
    %10 = arith.maximumf %8, %9 : vector<8x544xf32>
    %c0_7 = arith.constant 0 : index
    %c0_8 = arith.constant 0 : index
    %c0_9 = arith.constant 0 : index
    %c0_10 = arith.constant 0 : index
    %11 = vector.load %arg5[%c0_7, %c0_8, %c0_9, %c0_10] : memref<1x1x8x544xf32, #tpu.memory_space<vmem>>, vector<1x1x8x544xf32>
    %12 = vector.shape_cast %11 : vector<1x1x8x544xf32> to vector<8x544xf32>
    %13 = vector.shape_cast %10 : vector<8x544xf32> to vector<1x1x8x544xf32>
    tpu.vector_store %arg5[%c0_7, %c0_8, %c0_9, %c0_10], %13 {strides = array<i32>} : memref<1x1x8x544xf32, #tpu.memory_space<vmem>>, vector<1x1x8x544xf32>,
    return
  }
  func.func @transform_0(%arg0: i32, %arg1: i32) -> (i32, i32, i32, i32) {
    %c0_i32 = arith.constant 0 : i32
    %c0_i32_0 = arith.constant 0 : i32
    %c0_i32_1 = arith.constant 0 : i32
    return %arg0, %arg1, %c0_i32, %c0_i32_0 : i32, i32, i32, i32
  }
  func.func @transform_1(%arg0: i32, %arg1: i32) -> (i32, i32) {
    %c0_i32 = arith.constant 0 : i32
    %c0_i32_0 = arith.constant 0 : i32
    %c0_i32_1 = arith.constant 0 : i32
    return %c0_i32, %c0_i32_0 : i32, i32
  }
  func.func @transform_2(%arg0: i32, %arg1: i32) -> (i32, i32) {
    %c0_i32 = arith.constant 0 : i32
    %c0_i32_0 = arith.constant 0 : i32
    %c0_i32_1 = arith.constant 0 : i32
    return %c0_i32, %c0_i32_0 : i32, i32
  }
  func.func @transform_3(%arg0: i32, %arg1: i32) -> (i32, i32, i32, i32) {
    %c0_i32 = arith.constant 0 : i32
    %c0_i32_0 = arith.constant 0 : i32
    %c0_i32_1 = arith.constant 0 : i32
    return %arg0, %arg1, %c0_i32, %c0_i32_0 : i32, i32, i32, i32
  }
}

</mosaic_0001>

<bundles_post_ra>
// kernel: up_conv_forward.3
= control target key start
LH: loop header
LB: loop body
LE: loop exit
PB: predicated region body
PF: predicated region fallthrough
CT: control target
= control target key end

     0   :  { %s457_s12 = smov 0   ;;  %s459_s13 = smov 0   ;;  %s514_s0 = inlined_call_operand.vmem [shape: bf16[2,2,8,544], index: 0, kind: input, shape index: {}]   ;;  %s515_s1 = inlined_call_operand.vmem [shape: f32[8,1], index: 1, kind: input, shape index: {}]   ;;  %s516_s2 = inlined_call_operand.vmem [shape: f32[8,1], index: 2, kind: input, shape index: {}]   ;;  %s517_s3 = inlined_call_operand.vmem [shape: f32[2,2,8,544], index: 3, kind: output, shape index: {}]  }
   0x1   :  { %s461_s14 = smov 0   ;;  %s463_s15 = smov 0  }
   0x2   :  { %s465_s16 = smov 0  }
   0x3 LB: > { %s22_s17 = sadd.s32 1, %s426_s14  ;;  %s25_s18 = sadd.s32 1, %s430_s15  ;;  %s434_s16 = sphi %s465_s16, %s13_s16   ;;  %s430_s15 = sphi %s463_s15, %s521_s15   ;;  %s426_s14 = sphi %s461_s14, %s520_s14   ;;  %s422_s13 = sphi %s459_s13, %s519_s13   ;;  %s418_s12 = sphi %s457_s12, %s518_s12  }
   0x4   : > { %p23_p0 = scmp.ge.s32.totalorder %s22_s17, 2  ;;  %p347_p1 = scmp.ge.s32.totalorder %s434_s16, 1 }
   0x5   : > { %p157_p2 = scmp.lt.s32.totalorder %s434_s16, 5 }
   0x6   : > { %s523_s17 = smov (%p23_p0, %s22_s17), 0  ;;  %s525_s18 = smov (!%p23_p0, %s25_s18), %s430_s15 }
   0x7   : > { %p158_p3 = pnand %p347_p1, %p157_p2  ;;  %p27_p4 = scmp.ge.s32.totalorder %s525_s18, 2 }
   0x8   : > { %p189_p5 = scmp.lt.s32.totalorder (!%p158_p3), %s422_s13, 1  ;;  %p191_p6 = scmp.lt.s32.totalorder (!%p158_p3), %s418_s12, 1 }
   0x9   : > { %s527_s18 = smov (%p27_p4, %s525_s18), 0  ;;  %161 = sbr.rel (%p158_p3) target bundleno = 151 (0x97), region = 32 }
   0xe   : > { %v215_v0 = vld [vmem:[%s515_s1] sm:$0xff]  ;;  %v436_v1 = vmov 0   ;;  %s529_s13 = smov (!%p189_p5, %s422_s13), 1  ;;  %s531_s12 = smov (!%p191_p6, %s418_s12), 1  ;;  %vm246_vm0 = vcmask 261120  }
   0xf   : > { %395 = vset.pattern.permute.xlu0 %v436_v1  ;;  %v226_v2 = vld [vmem:[%s516_s2] sm:$0xff]  ;;  %s353_s23 = smul.u32 10, %s529_s13 }
  0x10   : > { %218 = vperm.xlu0 %395, %v215_v0   ;;  %s352_s24 = smul.u32 5, %s531_s12 }
  0x12   : > { %s195_s25 = sadd.s32 %s353_s23, %s352_s24 }
  0x13   : > { %s348_s26 = sshll.u32 %s195_s25, 2  ;;  %s349_s30 = sshll.u32 %s195_s25, 3 }
  0x14   : > { %229 = vperm.xlu0 %395, %v226_v2   ;;  %s197_s29 = scalar_lea.vmem %s514_s0, %s348_s26  ;;  %s206_s6 = scalar_lea.vmem %s517_s3, %s349_s30 }
  0x15   : > { %v207_v3 = vld [vmem:[%s197_s29] sm:$0xff]  ;;  %v208_v4 = vld [vmem:[%s197_s29 + $0x8] sm:$0xff]  ;;  %v209_v5 = vld [vmem:[%s197_s29 + $0x10] sm:$0xf] }
  0x16   : > { %v210_v6 = vunpack.c.l.bf16 %v207_v3  ;;  %v211_v7 = vunpack.c.h.bf16 %v207_v3  ;;  %v212_v8 = vunpack.c.l.bf16 %v208_v4  ;;  %v213_v9 = vunpack.c.h.bf16 %v208_v4 }
  0x17   : > { %v214_v11 = vunpack.c.l.bf16 %v209_v5 }
  0x8b   : > { %v219_v10 = vpop.permute.xlu0 %218 }
  0x8c   : > { %v221_v12 = vmul.f32 %v219_v10, %v210_v6  ;;  %v222_v13 = vmul.f32 %v219_v10, %v211_v7  ;;  %v223_v14 = vmul.f32 %v219_v10, %v212_v8  ;;  %v224_v15 = vmul.f32 %v219_v10, %v213_v9 }
  0x8d   : > { %v225_v17 = vmul.f32 %v219_v10, %v214_v11 }
  0x8f   : > { %v230_v16 = vpop.permute.xlu0 %229 }
  0x90   : > { %v232_v18 = vadd.f32 %v230_v16, %v221_v12  ;;  %v233_v19 = vadd.f32 %v230_v16, %v222_v13  ;;  %v234_v20 = vadd.f32 %v230_v16, %v223_v14  ;;  %v235_v21 = vadd.f32 %v230_v16, %v224_v15 }
  0x91   : > { %v236_v22 = vadd.f32 %v230_v16, %v225_v17 }
  0x92   : > { %v237_v23 = vmax.f32 %v232_v18, 0.0  ;;  %v238_v24 = vmax.f32 %v233_v19, 0.0  ;;  %v239_v25 = vmax.f32 %v234_v20, 0.0  ;;  %v240_v26 = vmax.f32 %v235_v21, 0.0 }
  0x93   : > { %v241_v27 = vmax.f32 %v236_v22, 0.0 }
  0x94   : > { %242 = vst [vmem:[%s206_s6] sm:$0xff] %v237_v23  ;;  %243 = vst [vmem:[%s206_s6 + $0x8] sm:$0xff] %v238_v24 }
  0x95   : > { %244 = vst [vmem:[%s206_s6 + $0x10] sm:$0xff] %v239_v25  ;;  %245 = vst [vmem:[%s206_s6 + $0x18] sm:$0xff] %v240_v26 }
  0x96   : > { %247 = vst.msk [vmem:[%s206_s6 + $0x20] sm:$0xff] %vm246_vm0, %v241_v27 }
  0x97 PF: > { %s13_s16 = sadd.s32 1, %s434_s16   ;;  %s518_s12 = smov %s426_s14 }
  0x98   : > { %p10_p7 = scmp.ge.s32.totalorder %s13_s16, 6   ;;  %s519_s13 = smov %s430_s15 }
  0x99   : > { %s520_s14 = smov %s523_s17  ;;  %s521_s15 = smov %s527_s18 }
  0x9a   :  { %12 = sbr.rel (!%p10_p7) target bundleno = 3 (0x3), region = 62 }

// kernel: up_conv_forward.2
= control target key start
LH: loop header
LB: loop body
LE: loop exit
PB: predicated region body
PF: predicated region fallthrough
CT: control target
= control target key end

     0   :  { %s2419_s15 = smov 0   ;;  %s2421_s16 = smov 0   ;;  %s2775_s0 = inlined_call_operand.vmem [shape: bf16[2,2,4,614], index: 0, kind: input, shape index: {}]   ;;  %s2776_s1 = inlined_call_operand.vmem [shape: bf16[9,8,4], index: 1, kind: input, shape index: {}]   ;;  %s2777_s2 = inlined_call_operand.vmem [shape: f32[1,544], index: 2, kind: input, shape index: {}]   ;;  %s2778_s3 = inlined_call_operand.vmem [shape: bf16[2,2,8,544], index: 3, kind: output, shape index: {0}]   ;;  %s2779_s4 = inlined_call_operand.vmem [shape: f32[2,2,8,2], index: 4, kind: output, shape index: {1}]  }
   0x1   :  { %s2423_s17 = smov 0   ;;  %s2425_s18 = smov 0  }
   0x2   :  { %s2427_s19 = smov 0  }
   0x3 LB: > { %s24_s20 = sadd.s32 1, %s2372_s17  ;;  %s27_s21 = sadd.s32 1, %s2376_s18  ;;  %s2380_s19 = sphi %s2427_s19, %s15_s19   ;;  %s2376_s18 = sphi %s2425_s18, %s2783_s18   ;;  %s2372_s17 = sphi %s2423_s17, %s2782_s17   ;;  %s2368_s16 = sphi %s2421_s16, %s2781_s16   ;;  %s2364_s15 = sphi %s2419_s15, %s2780_s15  }
   0x4   : > { %p25_p0 = scmp.ge.s32.totalorder %s24_s20, 2  ;;  %p2141_p1 = scmp.ge.s32.totalorder %s2380_s19, 1 }
   0x5   : > { %p187_p2 = scmp.lt.s32.totalorder %s2380_s19, 5 }
   0x6   : > { %s2785_s20 = smov (%p25_p0, %s24_s20), 0  ;;  %s2787_s21 = smov (!%p25_p0, %s27_s21), %s2376_s18 }
   0x7   : > { %p188_p3 = pnand %p2141_p1, %p187_p2  ;;  %p29_p4 = scmp.ge.s32.totalorder %s2787_s21, 2 }
   0x8   : > { %p229_p5 = scmp.lt.s32.totalorder (!%p188_p3), %s2368_s16, 1  ;;  %p231_p6 = scmp.lt.s32.totalorder (!%p188_p3), %s2364_s15, 1 }
   0x9   : > { %s2789_s21 = smov (%p29_p4, %s2787_s21), 0  ;;  %191 = sbr.rel (%p188_p3) target bundleno = 595 (0x253), region = 32 }
   0xa   : > { %s2384_s29 = smov (!%p188_p3), 127   ;;  %s2385_s30 = smov (!%p188_p3), 126  }
   0xb   : > { %s2386_s5 = smov (!%p188_p3), 94   ;;  %s2387_s6 = smov (!%p188_p3), 93  }
   0xc   : > { %s2388_s7 = smov (!%p188_p3), 92   ;;  %s2389_s8 = smov (!%p188_p3), 60  }
   0xd   : > { %s2390_s9 = smov (!%p188_p3), 59   ;;  %s2391_s10 = smov (!%p188_p3), 58  }
   0xe   : > { %v267_v0 = vlaneseq  ;;  %v2382_v1 = vmov 1983009808   ;;  %s2791_s16 = smov (!%p229_p5, %s2368_s16), 1  ;;  %s2793_s15 = smov (!%p231_p6, %s2364_s15), 1  ;;  %v2383_v6 = vmov 0   ;;  %vm297_vm0 = vcmask 1039360  }
   0xf   : > { %v265_v2 = vunpack.c.l.s4 %v2382_v1  ;;  %s2288_s22 = smul.u32 10, %s2791_s16  ;;  %354 = vmatprep.mubr.bf16.mxu0 %v2383_v6  ;;  %395 = vmatprep.mubr.bf16.mxu1 %v2383_v6  ;;  %vm306_vm1 = vcmask 1041408   ;;  %v2146_v21 = vld [vmem:[%s2776_s1 + $0x4] sm:$0xf]  ;;  %vm302_vm2 = vcmask 31744   ;;  %v2392_v24 = vmov 0.0  }
  0x10   : > { %v2453_v4 = vshrl.u32 %v267_v0, 7  ;;  %s2287_s23 = smul.u32 5, %s2793_s15  ;;  %vm2393_vm3 = vmmov 0   ;;  %vm624_vm4 = vcmask 1031168   ;;  %v256_v36 = vld [vmem:[%s2776_s1] sm:$0xf] }
  0x11   : > { %v266_v3 = vunpack.c.0.s8 %v265_v2  ;;  %vm814_vm5 = vcmask 769024   ;;  %v2158_v50 = vld [vmem:[%s2776_s1 + $0x8] sm:$0xf]  ;;  %vm1004_vm6 = vcmask 760832   ;;  %v2165_v0 = vld [vmem:[%s2776_s1 + $0xc] sm:$0xf] }
  0x12   : > { %s2457_s24 = sadd.s32 %s2288_s22, %s2287_s23  ;;  %vm1194_vm7 = vcmask 752640   ;;  %vm1384_vm8 = vcmask 490496   ;;  %vm1574_vm9 = vcmask 482304   ;;  %vm1764_vm10 = vcmask 474112  }
  0x13   : > { %v269_v5 = vsub.s32 %v266_v3, %v2453_v4  ;;  %s2142_s25 = sshll.u32 %s2457_s24, 1  ;;  %s2143_s13 = sshll.u32 %s2457_s24, 2  ;;  %vm1993_vm11 = vcmask 257024   ;;  %vm1949_vm12 = vcmask 261120   ;;  %vm1966_vm13 = vcmask 7168  }
  0x14   : > { %s237_s28 = scalar_lea.vmem %s2775_s0, %s2142_s25  ;;  %s2748_s23 = scalar_lea.vmem %s2778_s3, %s2143_s13  ;;  %vm1968_vm14 = vcmask 15360  }
  0x15   : > { %v257_v7 = vld [vmem:[%s237_s28] sm:$0xff]  ;;  %v2481_v13 = vld.sshfl [vmem:[%s237_s28 + $0x8] sm:$0x3 pattern:$0x76325410]  ;;  %s2144_s24 = sshll.u32 %s2791_s16, 1 }
  0x16   : > { %v2466_v8 = vrot.slane %v257_v7, %v269_v5  ;;  %v263_v9 = vcombine.high %v257_v7, %v257_v7  ;;  %v460_v37 = vsel %vm306_vm1, %v2481_v13, 0  ;;  %s252_s25 = sadd.s32 %s2144_s24, %s2793_s15 }
  0x17   : > { %s2145_s26 = sshll.u32 %s252_s25, 3 }
  0x18   : > { %287 = vrot.lane.b32.xlu0 %v2466_v8, %s2384_s29  ;;  %v2469_v10 = vrot.slane %v263_v9, %v269_v5  ;;  %v2473_v11 = vcombine.high %v2466_v8, %v2466_v8  ;;  %v448_v29 = vsel %vm306_vm1, %v2466_v8, 0 }
  0x1a   : > { %291 = vrot.lane.b32.xlu1 %v2469_v10, %s2384_s29  ;;  %v2478_v12 = vcombine.high %v2469_v10, %v2469_v10  ;;  %v454_v32 = vsel %vm306_vm1, %v2469_v10, 0 }
  0x1c   : > { %289 = vrot.lane.b32.xlu0 %v2473_v11, %s2384_s29 }
  0x1e   : > { %293 = vrot.lane.b32.xlu1 %v2478_v12, %s2384_s29 }
  0x20   : > { %295 = vrot.lane.b32.xlu0 %v2481_v13, %s2384_s29  ;;  %s254_s29 = scalar_lea.vmem %s2779_s4, %s2145_s26 }
  0x22   : > { %614 = vrot.lane.b32.xlu1 %v2466_v8, %s2385_s30 }
  0x24   : > { %616 = vrot.lane.b32.xlu0 %v2473_v11, %s2385_s30 }
  0x26   : > { %618 = vrot.lane.b32.xlu1 %v2469_v10, %s2385_s30 }
  0x28   : > { %620 = vrot.lane.b32.xlu0 %v2478_v12, %s2385_s30 }
  0x2a   : > { %622 = vrot.lane.b32.xlu1 %v2481_v13, %s2385_s30 }
  0x2c   : > { %804 = vrot.lane.b32.xlu0 %v2466_v8, %s2386_s5 }
  0x2e   : > { %806 = vrot.lane.b32.xlu1 %v2473_v11, %s2386_s5 }
  0x30   : > { %808 = vrot.lane.b32.xlu0 %v2469_v10, %s2386_s5 }
  0x32   : > { %810 = vrot.lane.b32.xlu1 %v2478_v12, %s2386_s5 }
  0x34   : > { %812 = vrot.lane.b32.xlu0 %v2481_v13, %s2386_s5 }
  0x36   : > { %994 = vrot.lane.b32.xlu1 %v2466_v8, %s2387_s6 }
  0x38   : > { %996 = vrot.lane.b32.xlu0 %v2473_v11, %s2387_s6 }
  0x3a   : > { %998 = vrot.lane.b32.xlu1 %v2469_v10, %s2387_s6 }
  0x3c   : > { %1000 = vrot.lane.b32.xlu0 %v2478_v12, %s2387_s6 }
  0x3e   : > { %1002 = vrot.lane.b32.xlu1 %v2481_v13, %s2387_s6 }
  0x40   : > { %1184 = vrot.lane.b32.xlu0 %v2466_v8, %s2388_s7 }
  0x42   : > { %1186 = vrot.lane.b32.xlu1 %v2473_v11, %s2388_s7 }
  0x44   : > { %1188 = vrot.lane.b32.xlu0 %v2469_v10, %s2388_s7 }
  0x46   : > { %1190 = vrot.lane.b32.xlu1 %v2478_v12, %s2388_s7 }
  0x48   : > { %1192 = vrot.lane.b32.xlu0 %v2481_v13, %s2388_s7 }
  0x4a   : > { %1374 = vrot.lane.b32.xlu1 %v2466_v8, %s2389_s8 }
  0x4c   : > { %1376 = vrot.lane.b32.xlu0 %v2473_v11, %s2389_s8 }
  0x4e   : > { %1378 = vrot.lane.b32.xlu1 %v2469_v10, %s2389_s8 }
  0x50   : > { %1380 = vrot.lane.b32.xlu0 %v2478_v12, %s2389_s8 }
  0x52   : > { %1382 = vrot.lane.b32.xlu1 %v2481_v13, %s2389_s8 }
  0x54   : > { %1564 = vrot.lane.b32.xlu0 %v2466_v8, %s2390_s9 }
  0x56   : > { %1566 = vrot.lane.b32.xlu1 %v2473_v11, %s2390_s9 }
  0x58   : > { %1568 = vrot.lane.b32.xlu0 %v2469_v10, %s2390_s9 }
  0x5a   : > { %1570 = vrot.lane.b32.xlu1 %v2478_v12, %s2390_s9 }
  0x5c   : > { %1572 = vrot.lane.b32.xlu0 %v2481_v13, %s2390_s9 }
  0x5e   : > { %1754 = vrot.lane.b32.xlu1 %v2466_v8, %s2391_s10 }
  0x60   : > { %1756 = vrot.lane.b32.xlu0 %v2473_v11, %s2391_s10 }
  0x62   : > { %1758 = vrot.lane.b32.xlu1 %v2469_v10, %s2391_s10 }
  0x64   : > { %1760 = vrot.lane.b32.xlu0 %v2478_v12, %s2391_s10 }
  0x66   : > { %1762 = vrot.lane.b32.xlu1 %v2481_v13, %s2391_s10 }
  0x8a   : > { %v288_v14 = vpop.permute.xlu0 %287 }
  0x8c   : > { %v292_v15 = vpop.permute.xlu1 %291 }
  0x8e   : > { %v290_v16 = vpop.permute.xlu0 %289 }
  0x8f   : > { %v299_v17 = vsel %vm297_vm0, %v290_v16, %v292_v15  ;;  %v298_v18 = vsel %vm297_vm0, %v288_v14, %v290_v16 }
  0x90   : > { %2148 = vmatprep.subr.msk.bf16.mxu0 %vm306_vm1, %v299_v17  ;;  %v294_v19 = vpop.permute.xlu1 %293  ;;  %v308_v20 = vsel %vm306_vm1, %v298_v18, 0 }
  0x91   : > { %337 = vmatpush1.bf16.msra.mxu0 %v308_v20  ;;  %v300_v22 = vsel %vm297_vm0, %v292_v15, %v294_v19  ;;  %v2172_v15 = vld [vmem:[%s2776_s1 + $0x10] sm:$0xf] }
  0x92   : > { %v296_v23 = vpop.permute.xlu0 %295  ;;  %2233 = vmatprep.subr.bf16.mxu0 %v2392_v24  ;;  %v314_v27 = vsel %vm306_vm1, %v300_v22, 0 }
  0x93   : > { %v320_v25 = vsel %vm306_vm1, %v296_v23, 0  ;;  %v301_v26 = vsel %vm297_vm0, %v294_v19, %v296_v23 }
  0x94   : > { %2149 = vmatmul.mubr.msk.bf16.vlgmr.msra.gmra.mxu0 %vm302_vm2, %v2146_v21  ;;  %2150 = vmatprep.subr.msk.bf16.mxu1 %vm306_vm1, %v301_v26  ;;  %v615_v28 = vpop.permute.xlu1 %614 }
  0x95   : > { %378 = vmatpush1.bf16.msra.mxu1 %v314_v27  ;;  %2234 = vmatpush3.bf16.msra.mxu0 %v320_v25 }
  0x96   : > { %2153 = vmatprep.subr.msk.bf16.mxu1 %vm306_vm1, %v2473_v11  ;;  %2235 = vmatprep.mubr.msk.bf16.mxu0 %vm2393_vm3, %v2392_v24  ;;  %v617_v30 = vpop.permute.xlu0 %616 }
  0x97   : > { %2155 = vmatprep.subr.msk.bf16.mxu0 %vm306_vm1, %v2478_v12  ;;  %v625_v39 = vsel %vm624_vm4, %v615_v28, %v617_v30 }
  0x98   : > { %2151 = vmatmul.mubr.msk.bf16.vlgmr.msra.gmra.mxu1 %vm302_vm2, %v2146_v21  ;;  %v619_v31 = vpop.permute.xlu1 %618  ;;  %v633_v42 = vsel %vm306_vm1, %v625_v39, 0 }
  0x99   : > { %477 = vmatpush1.bf16.msra.mxu1 %v448_v29  ;;  %494 = vmatprep.mubr.bf16.mxu1 %v2383_v6  ;;  %v626_v34 = vsel %vm624_vm4, %v617_v30, %v619_v31  ;;  %v2179_v29 = vld [vmem:[%s2776_s1 + $0x14] sm:$0xf] }
  0x9a   : > { %2239 = vmatprep.subr.bf16.mxu1 %v2392_v24  ;;  %v621_v33 = vpop.permute.xlu0 %620 }
  0x9b   : > { %v627_v44 = vsel %vm624_vm4, %v619_v31, %v621_v33 }
  0x9c   : > { %2236 = vmatmul.mubr.msk.bf16.vlgmr.msra.gmra.mxu0 %vm302_vm2, %v2146_v21  ;;  %v623_v35 = vpop.permute.xlu1 %622  ;;  %v639_v46 = vsel %vm306_vm1, %v627_v44, 0 }
  0x9d   : > { %518 = vmatpush1.bf16.msra.mxu0 %v454_v32  ;;  %535 = vmatprep.mubr.bf16.mxu0 %v2383_v6  ;;  %v628_v40 = vsel %vm624_vm4, %v621_v33, %v623_v35  ;;  %v645_v51 = vsel %vm306_vm1, %v623_v35, 0 }
  0x9e   : > { %2160 = vmatprep.subr.msk.bf16.mxu0 %vm306_vm1, %v626_v34  ;;  %v805_v38 = vpop.permute.xlu0 %804 }
  0xa0   : > { %2154 = vmatmul.mubr.msk.bf16.vlgmr.msra.gmra.mxu1 %vm302_vm2, %v256_v36  ;;  %v807_v41 = vpop.permute.xlu1 %806 }
  0xa1   : > { %2240 = vmatpush3.bf16.msra.mxu1 %v460_v37  ;;  %2241 = vmatprep.mubr.msk.bf16.mxu1 %vm2393_vm3, %v2392_v24  ;;  %v815_v53 = vsel %vm814_vm5, %v805_v38, %v807_v41 }
  0xa2   : > { %2162 = vmatprep.subr.msk.bf16.mxu1 %vm306_vm1, %v628_v40  ;;  %v809_v43 = vpop.permute.xlu0 %808  ;;  %v823_v56 = vsel %vm306_vm1, %v815_v53, 0  ;;  %v2193_v53 = vld [vmem:[%s2776_s1 + $0x1c] sm:$0xf] }
  0xa3   : > { %v816_v48 = vsel %vm814_vm5, %v807_v41, %v809_v43  ;;  %v2186_v41 = vld [vmem:[%s2776_s1 + $0x18] sm:$0xf] }
  0xa4   : > { %2156 = vmatmul.mubr.msk.bf16.vlgmr.msra.gmra.mxu0 %vm302_vm2, %v256_v36  ;;  %v811_v45 = vpop.permute.xlu1 %810 }
  0xa5   : > { %662 = vmatpush1.bf16.msra.mxu0 %v633_v42  ;;  %679 = vmatprep.mubr.bf16.mxu0 %v2383_v6  ;;  %v817_v58 = vsel %vm814_vm5, %v809_v43, %v811_v45 }
  0xa6   : > { %2245 = vmatprep.subr.bf16.mxu0 %v2392_v24  ;;  %v813_v47 = vpop.permute.xlu0 %812  ;;  %v829_v60 = vsel %vm306_vm1, %v817_v58, 0 }
  0xa7   : > { %v818_v54 = vsel %vm814_vm5, %v811_v45, %v813_v47  ;;  %v835_v1 = vsel %vm306_vm1, %v813_v47, 0 }
  0xa8   : > { %2242 = vmatmul.mubr.msk.bf16.vlgmr.msra.gmra.mxu1 %vm302_vm2, %v256_v36  ;;  %v995_v49 = vpop.permute.xlu1 %994 }
  0xa9   : > { %703 = vmatpush1.bf16.msra.mxu1 %v639_v46  ;;  %720 = vmatprep.mubr.bf16.mxu1 %v2383_v6 }
  0xaa   : > { %2167 = vmatprep.subr.msk.bf16.mxu1 %vm306_vm1, %v816_v48  ;;  %v997_v52 = vpop.permute.xlu0 %996 }
  0xab   : > { %v1005_v3 = vsel %vm1004_vm6, %v995_v49, %v997_v52 }
  0xac   : > { %2161 = vmatmul.mubr.msk.bf16.vlgmr.msra.gmra.mxu0 %vm302_vm2, %v2158_v50  ;;  %v999_v55 = vpop.permute.xlu1 %998  ;;  %v1013_v8 = vsel %vm306_vm1, %v1005_v3, 0 }
  0xad   : > { %2246 = vmatpush3.bf16.msra.mxu0 %v645_v51  ;;  %2247 = vmatprep.mubr.msk.bf16.mxu0 %vm2393_vm3, %v2392_v24  ;;  %v1006_v62 = vsel %vm1004_vm6, %v997_v52, %v999_v55 }
  0xae   : > { %2169 = vmatprep.subr.msk.bf16.mxu0 %vm306_vm1, %v818_v54  ;;  %v1001_v57 = vpop.permute.xlu0 %1000 }
  0xaf   : > { %v1007_v9 = vsel %vm1004_vm6, %v999_v55, %v1001_v57 }
  0xb0   : > { %2163 = vmatmul.mubr.msk.bf16.vlgmr.msra.gmra.mxu1 %vm302_vm2, %v2158_v50  ;;  %v1003_v59 = vpop.permute.xlu1 %1002  ;;  %v1019_v12 = vsel %vm306_vm1, %v1007_v9, 0 }
  0xb1   : > { %852 = vmatpush1.bf16.msra.mxu1 %v823_v56  ;;  %869 = vmatprep.mubr.bf16.mxu1 %v2383_v6  ;;  %v1008_v5 = vsel %vm1004_vm6, %v1001_v57, %v1003_v59  ;;  %v1025_v16 = vsel %vm306_vm1, %v1003_v59, 0 }
  0xb2   : > { %2251 = vmatprep.subr.bf16.mxu1 %v2392_v24  ;;  %v1185_v61 = vpop.permute.xlu0 %1184 }
  0xb4   : > { %2248 = vmatmul.mubr.msk.bf16.vlgmr.msra.gmra.mxu0 %vm302_vm2, %v2158_v50  ;;  %v1187_v63 = vpop.permute.xlu1 %1186 }
  0xb5   : > { %893 = vmatpush1.bf16.msra.mxu0 %v829_v60  ;;  %910 = vmatprep.mubr.bf16.mxu0 %v2383_v6  ;;  %v1195_v18 = vsel %vm1194_vm7, %v1185_v61, %v1187_v63  ;;  %v2200_v60 = vld [vmem:[%s2776_s1 + $0x20] sm:$0xf] }
  0xb6   : > { %2174 = vmatprep.subr.msk.bf16.mxu0 %vm306_vm1, %v1006_v62  ;;  %v1189_v2 = vpop.permute.xlu0 %1188  ;;  %v1203_v20 = vsel %vm306_vm1, %v1195_v18, 0 }
  0xb7   : > { %v1196_v13 = vsel %vm1194_vm7, %v1187_v63, %v1189_v2 }
  0xb8   : > { %2168 = vmatmul.mubr.msk.bf16.vlgmr.msra.gmra.mxu1 %vm302_vm2, %v2165_v0  ;;  %v1191_v7 = vpop.permute.xlu1 %1190 }
  0xb9   : > { %2252 = vmatpush3.bf16.msra.mxu1 %v835_v1  ;;  %2253 = vmatprep.mubr.msk.bf16.mxu1 %vm2393_vm3, %v2392_v24  ;;  %v1197_v22 = vsel %vm1194_vm7, %v1189_v2, %v1191_v7 }
  0xba   : > { %2176 = vmatprep.subr.msk.bf16.mxu1 %vm306_vm1, %v1008_v5  ;;  %v1193_v10 = vpop.permute.xlu0 %1192  ;;  %v1209_v25 = vsel %vm306_vm1, %v1197_v22, 0 }
  0xbb   : > { %v1198_v19 = vsel %vm1194_vm7, %v1191_v7, %v1193_v10  ;;  %v1215_v30 = vsel %vm306_vm1, %v1193_v10, 0 }
  0xbc   : > { %2170 = vmatmul.mubr.msk.bf16.vlgmr.msra.gmra.mxu0 %vm302_vm2, %v2165_v0  ;;  %v1375_v11 = vpop.permute.xlu1 %1374 }
  0xbd   : > { %1042 = vmatpush1.bf16.msra.mxu0 %v1013_v8  ;;  %1059 = vmatprep.mubr.bf16.mxu0 %v2383_v6 }
  0xbe   : > { %2257 = vmatprep.subr.bf16.mxu0 %v2392_v24  ;;  %v1377_v14 = vpop.permute.xlu0 %1376 }
  0xbf   : > { %v1385_v31 = vsel %vm1384_vm8, %v1375_v11, %v1377_v14 }
  0xc0   : > { %2254 = vmatmul.mubr.msk.bf16.vlgmr.msra.gmra.mxu1 %vm302_vm2, %v2165_v0  ;;  %v1379_v17 = vpop.permute.xlu1 %1378  ;;  %v1393_v33 = vsel %vm306_vm1, %v1385_v31, 0 }
  0xc1   : > { %1083 = vmatpush1.bf16.msra.mxu1 %v1019_v12  ;;  %1100 = vmatprep.mubr.bf16.mxu1 %v2383_v6  ;;  %v1386_v26 = vsel %vm1384_vm8, %v1377_v14, %v1379_v17 }
  0xc2   : > { %2181 = vmatprep.subr.msk.bf16.mxu1 %vm306_vm1, %v1196_v13  ;;  %v1381_v21 = vpop.permute.xlu0 %1380 }
  0xc3   : > { %v1387_v36 = vsel %vm1384_vm8, %v1379_v17, %v1381_v21 }
  0xc4   : > { %2175 = vmatmul.mubr.msk.bf16.vlgmr.msra.gmra.mxu0 %vm302_vm2, %v2172_v15  ;;  %v1383_v23 = vpop.permute.xlu1 %1382  ;;  %v1399_v37 = vsel %vm306_vm1, %v1387_v36, 0 }
  0xc5   : > { %2258 = vmatpush3.bf16.msra.mxu0 %v1025_v16  ;;  %2259 = vmatprep.mubr.msk.bf16.mxu0 %vm2393_vm3, %v2392_v24  ;;  %v1388_v32 = vsel %vm1384_vm8, %v1381_v21, %v1383_v23  ;;  %v1405_v42 = vsel %vm306_vm1, %v1383_v23, 0 }
  0xc6   : > { %2183 = vmatprep.subr.msk.bf16.mxu0 %vm306_vm1, %v1198_v19  ;;  %v1565_v27 = vpop.permute.xlu0 %1564 }
  0xc8   : > { %2177 = vmatmul.mubr.msk.bf16.vlgmr.msra.gmra.mxu1 %vm302_vm2, %v2172_v15  ;;  %v1567_v28 = vpop.permute.xlu1 %1566 }
  0xc9   : > { %1232 = vmatpush1.bf16.msra.mxu1 %v1203_v20  ;;  %1249 = vmatprep.mubr.bf16.mxu1 %v2383_v6  ;;  %v1575_v43 = vsel %vm1574_vm9, %v1565_v27, %v1567_v28 }
  0xca   : > { %2263 = vmatprep.subr.bf16.mxu1 %v2392_v24  ;;  %v1569_v34 = vpop.permute.xlu0 %1568  ;;  %v1583_v45 = vsel %vm306_vm1, %v1575_v43, 0 }
  0xcb   : > { %v1576_v38 = vsel %vm1574_vm9, %v1567_v28, %v1569_v34 }
  0xcc   : > { %2260 = vmatmul.mubr.msk.bf16.vlgmr.msra.gmra.mxu0 %vm302_vm2, %v2172_v15  ;;  %v1571_v35 = vpop.permute.xlu1 %1570 }
  0xcd   : > { %1273 = vmatpush1.bf16.msra.mxu0 %v1209_v25  ;;  %1290 = vmatprep.mubr.bf16.mxu0 %v2383_v6  ;;  %v1577_v48 = vsel %vm1574_vm9, %v1569_v34, %v1571_v35 }
  0xce   : > { %2188 = vmatprep.subr.msk.bf16.mxu0 %vm306_vm1, %v1386_v26  ;;  %v1573_v39 = vpop.permute.xlu0 %1572  ;;  %v1589_v49 = vsel %vm306_vm1, %v1577_v48, 0 }
  0xcf   : > { %v1578_v44 = vsel %vm1574_vm9, %v1571_v35, %v1573_v39  ;;  %v1595_v54 = vsel %vm306_vm1, %v1573_v39, 0 }
  0xd0   : > { %2182 = vmatmul.mubr.msk.bf16.vlgmr.msra.gmra.mxu1 %vm302_vm2, %v2179_v29  ;;  %v1755_v40 = vpop.permute.xlu1 %1754 }
  0xd1   : > { %2264 = vmatpush3.bf16.msra.mxu1 %v1215_v30  ;;  %2265 = vmatprep.mubr.msk.bf16.mxu1 %vm2393_vm3, %v2392_v24 }
  0xd2   : > { %2190 = vmatprep.subr.msk.bf16.mxu1 %vm306_vm1, %v1388_v32  ;;  %v1757_v46 = vpop.permute.xlu0 %1756 }
  0xd3   : > { %v1765_v55 = vsel %vm1764_vm10, %v1755_v40, %v1757_v46 }
  0xd4   : > { %2184 = vmatmul.mubr.msk.bf16.vlgmr.msra.gmra.mxu0 %vm302_vm2, %v2179_v29  ;;  %v1759_v47 = vpop.permute.xlu1 %1758  ;;  %v1773_v57 = vsel %vm306_vm1, %v1765_v55, 0 }
  0xd5   : > { %1422 = vmatpush1.bf16.msra.mxu0 %v1393_v33  ;;  %1439 = vmatprep.mubr.bf16.mxu0 %v2383_v6  ;;  %v1766_v50 = vsel %vm1764_vm10, %v1757_v46, %v1759_v47 }
  0xd6   : > { %2269 = vmatprep.subr.bf16.mxu0 %v2392_v24  ;;  %v1761_v51 = vpop.permute.xlu0 %1760 }
  0xd7   : > { %v1767_v58 = vsel %vm1764_vm10, %v1759_v47, %v1761_v51 }
  0xd8   : > { %2266 = vmatmul.mubr.msk.bf16.vlgmr.msra.gmra.mxu1 %vm302_vm2, %v2179_v29  ;;  %v1763_v52 = vpop.permute.xlu1 %1762  ;;  %v1779_v59 = vsel %vm306_vm1, %v1767_v58, 0 }
  0xd9   : > { %1463 = vmatpush1.bf16.msra.mxu1 %v1399_v37  ;;  %1480 = vmatprep.mubr.bf16.mxu1 %v2383_v6  ;;  %v1768_v56 = vsel %vm1764_vm10, %v1761_v51, %v1763_v52  ;;  %v1785_v61 = vsel %vm306_vm1, %v1763_v52, 0 }
  0xda   : > { %2195 = vmatprep.subr.msk.bf16.mxu1 %vm306_vm1, %v1576_v38 }
  0xdc   : > { %2189 = vmatmul.mubr.msk.bf16.vlgmr.msra.gmra.mxu0 %vm302_vm2, %v2186_v41 }
  0xdd   : > { %2270 = vmatpush3.bf16.msra.mxu0 %v1405_v42  ;;  %2271 = vmatprep.mubr.msk.bf16.mxu0 %vm2393_vm3, %v2392_v24 }
  0xde   : > { %2197 = vmatprep.subr.msk.bf16.mxu0 %vm306_vm1, %v1578_v44 }
  0xe0   : > { %2191 = vmatmul.mubr.msk.bf16.vlgmr.msra.gmra.mxu1 %vm302_vm2, %v2186_v41 }
  0xe1   : > { %1612 = vmatpush1.bf16.msra.mxu1 %v1583_v45  ;;  %1629 = vmatprep.mubr.bf16.mxu1 %v2383_v6 }
  0xe2   : > { %2275 = vmatprep.subr.bf16.mxu1 %v2392_v24 }
  0xe4   : > { %2272 = vmatmul.mubr.msk.bf16.vlgmr.msra.gmra.mxu0 %vm302_vm2, %v2186_v41 }
  0xe5   : > { %1653 = vmatpush1.bf16.msra.mxu0 %v1589_v49  ;;  %1670 = vmatprep.mubr.bf16.mxu0 %v2383_v6 }
  0xe6   : > { %2202 = vmatprep.subr.msk.bf16.mxu0 %vm306_vm1, %v1766_v50 }
  0xe8   : > { %2196 = vmatmul.mubr.msk.bf16.vlgmr.msra.gmra.mxu1 %vm302_vm2, %v2193_v53 }
  0xe9   : > { %2276 = vmatpush3.bf16.msra.mxu1 %v1595_v54  ;;  %2277 = vmatprep.mubr.msk.bf16.mxu1 %vm2393_vm3, %v2392_v24 }
  0xea   : > { %2204 = vmatprep.subr.msk.bf16.mxu1 %vm306_vm1, %v1768_v56 }
  0xec   : > { %2198 = vmatmul.mubr.msk.bf16.vlgmr.msra.gmra.mxu0 %vm302_vm2, %v2193_v53 }
  0xed   : > { %1802 = vmatpush1.bf16.msra.mxu0 %v1773_v57  ;;  %1819 = vmatprep.mubr.bf16.mxu0 %v2383_v6 }
  0xee   : > { %2281 = vmatprep.subr.bf16.mxu0 %v2392_v24 }
  0xf0   : > { %2278 = vmatmul.mubr.msk.bf16.vlgmr.msra.gmra.mxu1 %vm302_vm2, %v2193_v53 }
  0xf1   : > { %1843 = vmatpush1.bf16.msra.mxu1 %v1779_v59  ;;  %1860 = vmatprep.mubr.bf16.mxu1 %v2383_v6 }
  0xf4   : > { %2203 = vmatmul.mubr.msk.bf16.vlgmr.msra.gmra.mxu0 %vm302_vm2, %v2200_v60 }
  0xf5   : > { %2282 = vmatpush3.bf16.msra.mxu0 %v1785_v61  ;;  %2283 = vmatprep.mubr.msk.bf16.mxu0 %vm2393_vm3, %v2392_v24 }
  0xf8   : > { %2205 = vmatmul.mubr.msk.bf16.vlgmr.msra.gmra.mxu1 %vm302_vm2, %v2200_v60 }
  0xfc   : > { %2284 = vmatmul.mubr.msk.bf16.vlgmr.msra.gmra.mxu0 %vm302_vm2, %v2200_v60 }
 0x154   : > { %v356_v62 = vpop.f32.mrf.mxu0 }
 0x156   : > { %v358_v63 = vpop.f32.mrf.mxu0 }
 0x158   : > { %v360_v0 = vpop.f32.mrf.mxu0  ;;  %v397_v1 = vpop.f32.mrf.mxu1 }
 0x15a   : > { %v361_v2 = vpop.f32.mrf.mxu0  ;;  %v399_v3 = vpop.f32.mrf.mxu1 }
 0x15c   : > { %v401_v5 = vpop.f32.mrf.mxu1  ;;  %v438_v6 = vpop.f32.mrf.mxu0 }
 0x15e   : > { %v402_v7 = vpop.f32.mrf.mxu1  ;;  %v2237_v8 = vpop.f32.mrf.mxu0 }
 0x160   : > { %v441_v9 = vpop.f32.mrf.mxu0  ;;  %v496_v10 = vpop.f32.mrf.mxu1 }
 0x161   : > { %v2699_v11 = vadd.f32 %v496_v10, %v356_v62 }
 0x162   : > { %v2238_v12 = vpop.f32.mrf.mxu0  ;;  %v498_v24 = vpop.f32.mrf.mxu1 }
 0x163   : > { %v2701_v13 = vadd.f32 %v498_v24, %v358_v63 }
 0x164   : > { %v500_v14 = vpop.f32.mrf.mxu1  ;;  %v537_v15 = vpop.f32.mrf.mxu0 }
 0x165   : > { %v2703_v16 = vadd.f32 %v537_v15, %v397_v1 }
 0x166   : > { %v501_v17 = vpop.f32.mrf.mxu1  ;;  %v539_v18 = vpop.f32.mrf.mxu0 }
 0x167   : > { %v2705_v19 = vadd.f32 %v539_v18, %v399_v3 }
 0x168   : > { %v541_v20 = vpop.f32.mrf.mxu0  ;;  %v578_v21 = vpop.f32.mrf.mxu1 }
 0x169   : > { %v2707_v22 = vadd.f32 %v578_v21, %v438_v6 }
 0x16a   : > { %v542_v23 = vpop.f32.mrf.mxu0  ;;  %v2243_v25 = vpop.f32.mrf.mxu1 }
 0x16c   : > { %v581_v26 = vpop.f32.mrf.mxu1  ;;  %v681_v27 = vpop.f32.mrf.mxu0 }
 0x16e   : > { %v2244_v28 = vpop.f32.mrf.mxu1  ;;  %v683_v29 = vpop.f32.mrf.mxu0 }
 0x170   : > { %v685_v30 = vpop.f32.mrf.mxu0  ;;  %v2709_v31 = vpop.f32.mrf.mxu1 }
 0x172   : > { %v686_v32 = vpop.f32.mrf.mxu0  ;;  %v2711_v33 = vpop.f32.mrf.mxu1 }
 0x174   : > { %v726_v34 = vpop.f32.mrf.mxu1  ;;  %v2713_v35 = vpop.f32.mrf.mxu0 }
 0x175   : > { %v769_v34 = vadd.f32 %v681_v27, %v2699_v11 }
 0x176   : > { %v727_v36 = vpop.f32.mrf.mxu1  ;;  %v2249_v37 = vpop.f32.mrf.mxu0 }
 0x178   : > { %v766_v38 = vpop.f32.mrf.mxu0  ;;  %v871_v39 = vpop.f32.mrf.mxu1 }
 0x179   : > { %v770_v38 = vadd.f32 %v683_v29, %v2701_v13  ;;  %v1914_v13 = vld [vmem:[%s2777_s2] sm:$0x1f] }
 0x17a   : > { %v2250_v40 = vpop.f32.mrf.mxu0  ;;  %v873_v41 = vpop.f32.mrf.mxu1 }
 0x17b   : > { %v959_v40 = vadd.f32 %v871_v39, %v769_v34 }
 0x17c   : > { %v875_v42 = vpop.f32.mrf.mxu1  ;;  %v912_v43 = vpop.f32.mrf.mxu0 }
 0x17e   : > { %v876_v44 = vpop.f32.mrf.mxu1  ;;  %v2715_v45 = vpop.f32.mrf.mxu0 }
 0x180   : > { %v916_v46 = vpop.f32.mrf.mxu0  ;;  %v2717_v47 = vpop.f32.mrf.mxu1 }
 0x181   : > { %v771_v46 = vadd.f32 %v2709_v31, %v2703_v16  ;;  %v1922_v16 = vsub.s32 1, %v2453_v4 }
 0x182   : > { %v917_v48 = vpop.f32.mrf.mxu0  ;;  %v2255_v49 = vpop.f32.mrf.mxu1 }
 0x183   : > { %v960_v48 = vadd.f32 %v873_v41, %v770_v38  ;;  %v961_v11 = vadd.f32 %v912_v43, %v771_v46 }
 0x184   : > { %v956_v50 = vpop.f32.mrf.mxu1  ;;  %v1061_v51 = vpop.f32.mrf.mxu0 }
 0x185   : > { %v1149_v49 = vadd.f32 %v1061_v51, %v959_v40 }
 0x186   : > { %v2256_v52 = vpop.f32.mrf.mxu1  ;;  %v1063_v53 = vpop.f32.mrf.mxu0 }
 0x187   : > { %v1150_v27 = vadd.f32 %v1063_v53, %v960_v48  ;;  %v1926_v53 = vsub.s32 2, %v2453_v4 }
 0x188   : > { %v1065_v54 = vpop.f32.mrf.mxu0  ;;  %v1102_v55 = vpop.f32.mrf.mxu1 }
 0x189   : > { %v1918_v54 = vsub.s32 0, %v2453_v4  ;;  %v1151_v41 = vadd.f32 %v1102_v55, %v961_v11  ;;  %v1923_v55 = vrot.slane %v1914_v13, %v1922_v16 }
 0x18a   : > { %v1066_v56 = vpop.f32.mrf.mxu0  ;;  %v1104_v57 = vpop.f32.mrf.mxu1 }
 0x18b   : > { %v772_v56 = vadd.f32 %v2711_v33, %v2705_v19  ;;  %v1919_v43 = vrot.slane %v1914_v13, %v1918_v54 }
 0x18c   : > { %v1106_v58 = vpop.f32.mrf.mxu1  ;;  %v2719_v59 = vpop.f32.mrf.mxu0 }
 0x18d   : > { %v962_v31 = vadd.f32 %v2715_v45, %v772_v56 }
 0x18e   : > { %v1107_v60 = vpop.f32.mrf.mxu1  ;;  %v2261_v61 = vpop.f32.mrf.mxu0 }
 0x18f   : > { %v773_v61 = vadd.f32 %v2713_v35, %v2707_v22 }
 0x190   : > { %v1146_v62 = vpop.f32.mrf.mxu0  ;;  %v1251_v63 = vpop.f32.mrf.mxu1 }
 0x191   : > { %v1339_v58 = vadd.f32 %v1251_v63, %v1149_v49  ;;  %v1152_v62 = vadd.f32 %v1104_v57, %v962_v31  ;;  %v1927_v57 = vrot.slane %v1914_v13, %v1926_v53 }
 0x192   : > { %v2262_v0 = vpop.f32.mrf.mxu0  ;;  %v1253_v1 = vpop.f32.mrf.mxu1 }
 0x193   : > { %v1340_v51 = vadd.f32 %v1253_v1, %v1150_v27  ;;  %v1930_v1 = vsub.s32 3, %v2453_v4 }
 0x194   : > { %v1255_v2 = vpop.f32.mrf.mxu1  ;;  %v1292_v3 = vpop.f32.mrf.mxu0 }
 0x195   : > { %v1341_v63 = vadd.f32 %v1292_v3, %v1151_v41 }
 0x196   : > { %v1256_v5 = vpop.f32.mrf.mxu1  ;;  %v1294_v6 = vpop.f32.mrf.mxu0 }
 0x197   : > { %v963_v5 = vadd.f32 %v2717_v47, %v773_v61 }
 0x198   : > { %v1296_v7 = vpop.f32.mrf.mxu0  ;;  %v2721_v8 = vpop.f32.mrf.mxu1 }
 0x19a   : > { %v1297_v9 = vpop.f32.mrf.mxu0  ;;  %v2267_v10 = vpop.f32.mrf.mxu1 }
 0x19b   : > { %v1342_v9 = vadd.f32 %v1294_v6, %v1152_v62 }
 0x19c   : > { %v1336_v12 = vpop.f32.mrf.mxu1  ;;  %v1441_v24 = vpop.f32.mrf.mxu0 }
 0x19d   : > { %v1529_v60 = vadd.f32 %v1441_v24, %v1339_v58  ;;  %v1153_v12 = vadd.f32 %v2719_v59, %v963_v5  ;;  %v1934_v59 = vsub.s32 4, %v2453_v4 }
 0x19e   : > { %v2268_v14 = vpop.f32.mrf.mxu1  ;;  %v1443_v15 = vpop.f32.mrf.mxu0 }
 0x19f   : > { %v1530_v0 = vadd.f32 %v1443_v15, %v1340_v51  ;;  %v1343_v47 = vadd.f32 %v2721_v8, %v1153_v12  ;;  %v1935_v49 = vrot.slane %v1914_v13, %v1934_v59 }
 0x1a0   : > { %v1445_v17 = vpop.f32.mrf.mxu0  ;;  %v1482_v18 = vpop.f32.mrf.mxu1 }
 0x1a1   : > { %v1531_v10 = vadd.f32 %v1482_v18, %v1341_v63 }
 0x1a2   : > { %v1446_v20 = vpop.f32.mrf.mxu0  ;;  %v1484_v21 = vpop.f32.mrf.mxu1 }
 0x1a3   : > { %v1532_v3 = vadd.f32 %v1484_v21, %v1342_v9 }
 0x1a4   : > { %v1486_v23 = vpop.f32.mrf.mxu1  ;;  %v2723_v25 = vpop.f32.mrf.mxu0 }
 0x1a5   : > { %v1931_v23 = vrot.slane %v1914_v13, %v1930_v1 }
 0x1a6   : > { %v1487_v26 = vpop.f32.mrf.mxu1  ;;  %v2273_v28 = vpop.f32.mrf.mxu0 }
 0x1a8   : > { %v1526_v30 = vpop.f32.mrf.mxu0  ;;  %v1631_v32 = vpop.f32.mrf.mxu1 }
 0x1a9   : > { %v1719_v2 = vadd.f32 %v1631_v32, %v1529_v60  ;;  %v1533_v32 = vadd.f32 %v2723_v25, %v1343_v47 }
 0x1aa   : > { %v2274_v36 = vpop.f32.mrf.mxu0  ;;  %v1633_v37 = vpop.f32.mrf.mxu1 }
 0x1ab   : > { %v1720_v22 = vadd.f32 %v1633_v37, %v1530_v0 }
 0x1ac   : > { %v1635_v42 = vpop.f32.mrf.mxu1  ;;  %v1672_v44 = vpop.f32.mrf.mxu0 }
 0x1ad   : > { %v1721_v15 = vadd.f32 %v1672_v44, %v1531_v10 }
 0x1ae   : > { %v1636_v50 = vpop.f32.mrf.mxu1  ;;  %v1674_v52 = vpop.f32.mrf.mxu0 }
 0x1af   : > { %v1722_v26 = vadd.f32 %v1674_v52, %v1532_v3 }
 0x1b0   : > { %v1676_v29 = vpop.f32.mrf.mxu0  ;;  %v1713_v39 = vpop.f32.mrf.mxu1 }
 0x1b1   : > { %v1723_v44 = vadd.f32 %v1713_v39, %v1533_v32 }
 0x1b2   : > { %v1677_v19 = vpop.f32.mrf.mxu0  ;;  %v2279_v33 = vpop.f32.mrf.mxu1 }
 0x1b4   : > { %v1716_v7 = vpop.f32.mrf.mxu1  ;;  %v1821_v45 = vpop.f32.mrf.mxu0 }
 0x1b5   : > { %v1909_v35 = vadd.f32 %v1821_v45, %v1719_v2 }
 0x1b6   : > { %v2280_v24 = vpop.f32.mrf.mxu1  ;;  %v1823_v14 = vpop.f32.mrf.mxu0 }
 0x1b7   : > { %v1941_v17 = vmul.f32 %v1919_v43, %v1909_v35  ;;  %v1910_v20 = vadd.f32 %v1823_v14, %v1720_v22 }
 0x1b8   : > { %v1825_v6 = vpop.f32.mrf.mxu0  ;;  %v1862_v18 = vpop.f32.mrf.mxu1 }
 0x1b9   : > { %v1942_v28 = vmul.f32 %v1923_v55, %v1910_v20  ;;  %v2212_v30 = vpack.c.bf16 %v1910_v20, %v1909_v35  ;;  %v1911_v21 = vadd.f32 %v1862_v18, %v1721_v15  ;;  %v1954_v34 = vmul.f32 %v1941_v17, %v1909_v35 }
 0x1ba   : > { %v1826_v36 = vpop.f32.mrf.mxu0  ;;  %v1864_v8 = vpop.f32.mrf.mxu1 }
 0x1bb   : > { %v1946_v37 = vadd.f32 %v1942_v28, %v1941_v17  ;;  %v1955_v38 = vmul.f32 %v1942_v28, %v1910_v20  ;;  %1991 = vst [vmem:[%s2748_s23] sm:$0xff] %v2212_v30  ;;  %v1943_v40 = vmul.f32 %v1927_v57, %v1911_v21  ;;  %v1912_v42 = vadd.f32 %v1864_v8, %v1722_v26 }
 0x1bc   : > { %v1866_v46 = vpop.f32.mrf.mxu1  ;;  %v1903_v48 = vpop.f32.mrf.mxu0 }
 0x1bd   : > { %v1959_v4 = vadd.f32 %v1955_v38, %v1954_v34  ;;  %v1956_v50 = vmul.f32 %v1943_v40, %v1911_v21  ;;  %v1944_v52 = vmul.f32 %v1931_v23, %v1912_v42  ;;  %v2213_v54 = vpack.c.bf16 %v1912_v42, %v1911_v21 }
 0x1be   : > { %v1913_v56 = vadd.f32 %v1903_v48, %v1723_v44  ;;  %v1867_v25 = vpop.f32.mrf.mxu1  ;;  %v2285_v11 = vpop.f32.mrf.mxu0  ;;  %v1947_v27 = vadd.f32 %v1946_v37, %v1943_v40 }
 0x1bf   : > { %v1957_v58 = vmul.f32 %v1944_v52, %v1912_v42  ;;  %1992 = vst [vmem:[%s2748_s23 + $0x8] sm:$0xff] %v2213_v54  ;;  %v1960_v29 = vadd.f32 %v1959_v4, %v1956_v50 }
 0x1c0   : > { %v2214_v39 = vpack.c.bf16 %v1913_v56, %v1913_v56  ;;  %v1906_v16 = vpop.f32.mrf.mxu0  ;;  %v1945_v31 = vmul.f32 %v1935_v49, %v1913_v56  ;;  %v1948_v13 = vadd.f32 %v1947_v27, %v1944_v52 }
 0x1c1   : > { %v1961_v41 = vadd.f32 %v1960_v29, %v1957_v58 }
 0x1c2   : > { %1994 = vst.msk [vmem:[%s2748_s23 + $0x10] sm:$0xf] %vm1993_vm11, %v2214_v39  ;;  %v2286_v51 = vpop.f32.mrf.mxu0  ;;  %v1950_v60 = vsel %vm1949_vm12, %v1945_v31, 0.0  ;;  %v1958_v61 = vmul.f32 %v1945_v31, %v1913_v56 }
 0x1c3   : > { %v1951_v19 = vadd.f32 %v1950_v60, %v1948_v13 }
 0x1c4   : > { %v1962_v33 = vsel %vm1949_vm12, %v1958_v61, 0.0 }
 0x1c5   : > { %1952 = vadd.xlane.f32.xlu0 %v1951_v19  ;;  %v1963_v43 = vadd.f32 %v1962_v33, %v1961_v41 }
 0x1c7   : > { %1964 = vadd.xlane.f32.xlu1 %v1963_v43 }
 0x24e   : > { %v1953_v53 = vpop.xlane.xlu0 %1952 }
 0x250   : > { %v1965_v62 = vpop.xlane.xlu1 %1964 }
 0x251   : > { %v1967_v63 = vsel %vm1966_vm13, %v1953_v53, %v1965_v62 }
 0x252   : > { %1969 = vst.msk [vmem:[%s254_s29] sm:$0xff] %vm1968_vm14, %v1967_v63 }
 0x253 PF: > { %s15_s19 = sadd.s32 1, %s2380_s19   ;;  %s2780_s15 = smov %s2372_s17 }
 0x254   : > { %p12_p7 = scmp.ge.s32.totalorder %s15_s19, 6   ;;  %s2781_s16 = smov %s2376_s18 }
 0x255   : > { %s2782_s17 = smov %s2785_s20  ;;  %s2783_s18 = smov %s2789_s21 }
 0x256   :  { %14 = sbr.rel (!%p12_p7) target bundleno = 3 (0x3), region = 82 }

</bundles_post_ra>
